<compile_context>
chip_gen: v7x
topology: tpu7x:2x2x1
jax: 0.10.0
libtpu: 0.0.40
codegen_flags: <defaults>
</compile_context>

<pallas_src>
import functools

import jax
import jax.numpy as jnp
import numpy as np
from jax.experimental import pallas as pl
from jax.experimental.pallas import tpu as pltpu

_LANE = 128
_MAX_TILE_ROWS = 1024  # (1024, 128) f32 tile = 512 KiB; in+out double-buffered ~2 MiB VMEM


def _cosine_schedule_kernel(tau_ref, out_ref, *, scale, shift):
    # VPU: affine map into (0, pi/2).
    x = tau_ref[...].astype(jnp.float32) * scale + shift
    # 2*log(tan(x)) == log((1 - cos(2x)) / (1 + cos(2x)))
    # EUP ops per element: cos + reciprocal + log = 3.
    c2 = jnp.cos(2.0 * x)
    ratio = (1.0 - c2) * pl.reciprocal(1.0 + c2, approx=False)
    out_ref[...] = jnp.log(ratio).astype(out_ref.dtype)


class CosineNoiseSchedulerPallas:
    """JAX/Pallas port of CosineNoiseScheduler (forward as a Pallas kernel)."""

    def __init__(self, min_temp: float, max_temp: float):
        tau_min = 2.0 * np.arctan(min_temp ** 0.5) / np.pi
        tau_max = 2.0 * np.arctan(max_temp ** 0.5) / np.pi
        self.scale = float(0.5 * np.pi * (tau_max - tau_min))
        self.shift = float(0.5 * np.pi * tau_min)

    def forward(self, tau: jax.Array) -> jax.Array:
        orig_shape = tau.shape
        orig_dtype = tau.dtype

        if tau.size == 0:  # degenerate: nothing to compute
            return tau

        # Keep narrow float dtypes end-to-end (cast to f32 happens inside the kernel);
        # anything else (ints, f64-disabled weirdness) goes through f32.
        if orig_dtype in (jnp.float32, jnp.bfloat16, jnp.float16):
            compute_dtype = orig_dtype
        else:
            compute_dtype = jnp.float32

        flat = jnp.ravel(tau)
        if flat.dtype != compute_dtype:
            flat = flat.astype(compute_dtype)

        n = flat.shape[0]
        n_pad = ((n + _LANE - 1) // _LANE) * _LANE
        padded = n_pad != n
        if padded:
            # Benign pad value: keeps tan/log finite on the discarded tail.
            flat = jnp.pad(flat, (0, n_pad - n), constant_values=0.5)

        rows = n_pad // _LANE
        x2d = flat.reshape(rows, _LANE)

        # Small input: one grid step, block == full array (avoids per-step overhead).
        # Large input: big (1024, 128) tiles; ragged last block handled by masking.
        tile_rows = rows if rows <= _MAX_TILE_ROWS else _MAX_TILE_ROWS
        grid = (pl.cdiv(rows, tile_rows),)

        kernel = functools.partial(
            _cosine_schedule_kernel, scale=self.scale, shift=self.shift
        )

        out2d = pl.pallas_call(
            kernel,
            out_shape=jax.ShapeDtypeStruct((rows, _LANE), compute_dtype),
            grid=grid,
            in_specs=[pl.BlockSpec((tile_rows, _LANE), lambda i: (i, 0))],
            out_specs=pl.BlockSpec((tile_rows, _LANE), lambda i: (i, 0)),
            compiler_params=pltpu.CompilerParams(
                dimension_semantics=("parallel",)
            ),
        )(x2d)

        if padded:
            out = out2d.reshape(-1)[:n].reshape(orig_shape)
        else:
            out = out2d.reshape(orig_shape)
        if out.dtype != orig_dtype:
            out = out.astype(orig_dtype)
        return out

    def __call__(self, tau: jax.Array) -> jax.Array:
        return self.forward(tau)

    def get_tau(self, log_temp: jax.Array) -> jax.Array:
        # Inverse mapping (plain JAX glue; not a hot path).
        return (jnp.arctan(jnp.exp(log_temp * 0.5)) - self.shift) / self.scale


if __name__ == "__main__":
    # Deterministic "config": diffusion.temp_range = (1e-3, 1e3)
    min_temp, max_temp = 1e-3, 1e3
    sched = CosineNoiseSchedulerPallas(min_temp, max_temp)

    key = jax.random.PRNGKey(0)
    # tau is a normalized diffusion time in (0, 1); NCHW-like shape.
    tau = jax.random.uniform(
        key, (2, 4, 16, 16), dtype=jnp.float32, minval=1e-3, maxval=1.0 - 1e-3
    )

    out = sched(tau)
    out = jax.block_until_ready(out)

    # Reference in float64 (same math as the PyTorch forward).
    tau64 = np.asarray(tau, dtype=np.float64)
    ref = np.log(np.tan(tau64 * sched.scale + sched.shift)) * 2.0

    # Tolerance reflects the 3-transcendental rewrite (~1e-4 rel at the extreme
    # ends of the tau range); negligible for a log-temperature schedule.
    np.testing.assert_allclose(
        np.asarray(out, dtype=np.float64), ref, rtol=1e-4, atol=1e-4
    )

    # Round-trip sanity: get_tau(forward(tau)) ~= tau (plain-JAX inverse).
    tau_rt = jax.block_until_ready(sched.get_tau(out))
    np.testing.assert_allclose(
        np.asarray(tau_rt), np.asarray(tau), rtol=1e-3, atol=1e-3
    )

    assert out.shape == tau.shape and out.dtype == tau.dtype
    print("KERNEL_OK")
</pallas_src>

<mosaic_0001>
module attributes {stable_mosaic.version = 11 : i64} {
  func.func @_cosine_schedule_kernel(%arg0: i32, %arg1: memref<16x128xf32, #tpu.memory_space<vmem>>, %arg2: memref<16x128xf32, #tpu.memory_space<vmem>>) attributes {dimension_semantics = [#tpu.dimension_semantics<parallel>], iteration_bounds = array<i64: 1>, scalar_prefetch = 0 : i64, scratch_operands = 0 : i64, tpu.core_type = #tpu.core_type<tc>, window_params = [{transform_indices = @transform_0, window_bounds = array<i64: 16, 128>}, {transform_indices = @transform_1, window_bounds = array<i64: 16, 128>}]} {
    %c0 = arith.constant 0 : index
    %c0_0 = arith.constant 0 : index
    %0 = vector.load %arg1[%c0, %c0_0] : memref<16x128xf32, #tpu.memory_space<vmem>>, vector<16x128xf32>
    %cst = arith.constant 1.50757182 : f32
    %1 = vector.broadcast %cst : f32 to vector<16x128xf32>
    %2 = arith.mulf %0, %1 : vector<16x128xf32>
    %cst_1 = arith.constant 0.0316122435 : f32
    %3 = vector.broadcast %cst_1 : f32 to vector<16x128xf32>
    %4 = arith.addf %2, %3 : vector<16x128xf32>
    %cst_2 = arith.constant 2.000000e+00 : f32
    %5 = vector.broadcast %cst_2 : f32 to vector<16x128xf32>
    %6 = arith.mulf %5, %4 : vector<16x128xf32>
    %7 = math.cos %6 : vector<16x128xf32>
    %cst_3 = arith.constant 1.000000e+00 : f32
    %8 = vector.broadcast %cst_3 : f32 to vector<16x128xf32>
    %9 = arith.subf %8, %7 : vector<16x128xf32>
    %cst_4 = arith.constant 1.000000e+00 : f32
    %10 = vector.broadcast %cst_4 : f32 to vector<16x128xf32>
    %11 = arith.addf %10, %7 : vector<16x128xf32>
    %12 = tpu.reciprocal %11 : vector<16x128xf32> -> vector<16x128xf32>
    %13 = arith.mulf %9, %12 : vector<16x128xf32>
    %14 = math.log %13 : vector<16x128xf32>
    %c0_5 = arith.constant 0 : index
    %c0_6 = arith.constant 0 : index
    %15 = vector.load %arg2[%c0_5, %c0_6] : memref<16x128xf32, #tpu.memory_space<vmem>>, vector<16x128xf32>
    tpu.vector_store %arg2[%c0_5, %c0_6], %14 {strides = array<i32>} : memref<16x128xf32, #tpu.memory_space<vmem>>, vector<16x128xf32>,
    return
  }
  func.func @transform_0(%arg0: i32) -> (i32, i32) {
    %c0_i32 = arith.constant 0 : i32
    %c0_i32_0 = arith.constant 0 : i32
    return %arg0, %c0_i32 : i32, i32
  }
  func.func @transform_1(%arg0: i32) -> (i32, i32) {
    %c0_i32 = arith.constant 0 : i32
    %c0_i32_0 = arith.constant 0 : i32
    return %arg0, %c0_i32 : i32, i32
  }
}

</mosaic_0001>

<bundles_post_ra>
// kernel: tpu_custom_call.1
= control target key start
LH: loop header
LB: loop body
LE: loop exit
PB: predicated region body
PF: predicated region fallthrough
CT: control target
= control target key end

     0   :  { %6 = vsyncpa [#allocation3], 0  ;;  %s494_s0 = inlined_call_operand.hbm [shape: f32[16,128], index: 0, kind: input, shape index: {}]   ;;  %s495_s1 = inlined_call_operand.hbm [shape: f32[16,128], index: 1, kind: output, shape index: {}]  }
   0x1   :  { %7 = vsyncpa [#allocation4], 0  ;;  %s358_s6 = smov [#allocation2]   ;;  %s310_s10 = scalar_lea.hbm %s494_s0, 256 }
   0x2   :  { %s13_s7 = sshll.u32 %s358_s6, 4  ;;  %p311_p0 = scmp.ne.s32.totalorder %s494_s0, %s310_s10  ;;  %s14_s7 = int_to_ptr.vmem [resolvable:$true] %s13_s7 }
   0x3   :  { %p314_p1 = scmp.lt.u32.totalorder %s310_s10, %s494_s0 }
   0x5   :  { %p316_p2 = pnand %p314_p1, %p311_p0 }
   0x7   :  { %319 = shalt.err (!%p316_p2)
}
   0x8   :  { %s320_s15 = scalar_lea.vmem %s14_s7, 256  ;;  %p325_p4 = scmp.lt.s32.totalorder %s14_s7, %s14_s7 }
   0x9   :  { %p321_p3 = scmp.ne.s32.totalorder %s14_s7, %s320_s15  ;;  %p326_p5 = scmp.lt.s32.totalorder %s320_s15, %s320_s15 }
   0xb   :  { %p327_p6 = por %p326_p5, %p325_p4 }
   0xd   :  { %p328_p7 = pnand %p327_p6, %p321_p3 }
   0xf   :  { %331 = shalt.err (!%p328_p7)
}
  0x10   :  { %s359_s16 = smov 128   ;;  %s360_s17 = smov 8  }
  0x11   :  { %19 = dma.hbm_to_vmem [thread:$0]  %s494_s0, 256, %s14_s7, [#allocation3], %s359_s16, %s359_s16, %s360_s17  }
  0x12   :  { %354 = dma.done.wait [#allocation3], 256  }
  0x13   :  { %355 = vsyncadd [#allocation3], 4294967040  ;;  %v23_v0 = vld [vmem:[#allocation2] sm:$0xff]  ;;  %v24_v1 = vld [vmem:[#allocation2 + $0x8] sm:$0xff]  ;;  %v361_v30 = vmov 683565275  }
  0x14   :  { %v25_v2 = vmul.f32 1.5075718, %v23_v0  ;;  %v26_v3 = vmul.f32 1.5075718, %v24_v1  ;;  %v362_v32 = vmov 2475754826  }
  0x15   :  { %v363_v34 = vmov 2131351028   ;;  %v364_v36 = vmov 2102212464   ;;  %v365_v38 = vmov 920167782  }
  0x16   :  { %v27_v4 = vadd.f32 0.031612244, %v25_v2  ;;  %v28_v5 = vadd.f32 0.031612244, %v26_v3  ;;  %v366_v46 = vmov 1326507024  }
  0x17   :  { %s367_s0 = smov [#allocation5]  }
  0x18   :  { %v393_v6 = vmul.f32 2.0, %v27_v4  ;;  %v395_v7 = vmul.f32 2.0, %v28_v5  ;;  %s256_s20 = sshll.u32 %s367_s0, 4  ;;  %s257_s20 = int_to_ptr.vmem [resolvable:$true] %s256_s20 }
  0x19   :  { %s332_s21 = scalar_lea.vmem %s257_s20, 256  ;;  %p337_p9 = scmp.lt.s32.totalorder %s257_s20, %s257_s20 }
  0x1a   :  { %v31_v8 = vand.u32 2147483647, %v393_v6  ;;  %v34_v9 = vand.u32 2139095040, %v393_v6  ;;  %v134_v10 = vand.u32 2147483647, %v395_v7  ;;  %v137_v11 = vand.u32 2139095040, %v395_v7  ;;  %p333_p8 = scmp.ne.s32.totalorder %s257_s20, %s332_s21  ;;  %p338_p10 = scmp.lt.s32.totalorder %s332_s21, %s332_s21 }
  0x1b   :  { %vm33_vm14 = vcmp.lt.s32.totalorder %v393_v6, 0 }
  0x1c   :  { %v35_v12 = vshrl.u32 %v34_v9, 23  ;;  %v38_v13 = vand.u32 8388607, %v31_v8  ;;  %v138_v14 = vshrl.u32 %v137_v11, 23  ;;  %v141_v15 = vand.u32 8388607, %v134_v10  ;;  %p339_p11 = por %p338_p10, %p337_p9 }
  0x1d   :  { %vm456_vm15 = vcmp.le.f32.partialorder %v31_v8, 0.7853982 }
  0x1e   :  { %v268_v16 = vadd.s32 4294967169, %v35_v12  ;;  %v272_v17 = vadd.s32 4294967169, %v138_v14  ;;  %v39_v19 = vor.u32 8388608, %v38_v13  ;;  %v142_v20 = vor.u32 8388608, %v141_v15  ;;  %p340_p12 = pnand %p339_p11, %p333_p8 }
  0x20   :  { %v41_v18 = vadd.s32 1, %v268_v16  ;;  %v144_v21 = vadd.s32 1, %v272_v17  ;;  %v405_v26 = vshll.u32 %v39_v19, 8  ;;  %v407_v28 = vshll.u32 %v142_v20, 8 }
  0x22   :  { %vm42_vm0 = vcmp.gt.s32.totalorder %v41_v18, 0  ;;  %vm145_vm1 = vcmp.gt.s32.totalorder %v144_v21, 0 }
  0x23   :  { %v43_v22 = vsel %vm42_vm0, %v41_v18, 0  ;;  %v146_v25 = vsel %vm145_vm1, %v144_v21, 0  ;;  %vm136_vm0 = vcmp.lt.s32.totalorder %v395_v7, 0  ;;  %vm468_vm1 = vcmp.le.f32.partialorder %v134_v10, 0.7853982 }
  0x24   :  { %v44_v23 = vshrl.u32 %v43_v22, 5  ;;  %v45_v24 = vand.u32 31, %v43_v22  ;;  %v148_v27 = vand.u32 31, %v146_v25  ;;  %v409_v40 = vshrl.u32 %v146_v25, 5 }
  0x26   :  { %v46_v29 = vsub.s32 32, %v45_v24  ;;  %v48_v31 = vshll.u32 %v361_v30, %v45_v24  ;;  %v51_v33 = vshll.u32 %v362_v32, %v45_v24  ;;  %v54_v35 = vshll.u32 %v363_v34, %v45_v24 }
  0x27   :  { %v57_v37 = vshll.u32 %v364_v36, %v45_v24  ;;  %v60_v39 = vshll.u32 %v365_v38, %v45_v24  ;;  %vm63_vm2 = vcmp.lt.s32.totalorder %v44_v23, 1  ;;  %vm64_vm3 = vcmp.lt.s32.totalorder %v44_v23, 2 }
  0x28   :  { %v47_v41 = vshrl.u32 %v361_v30, %v46_v29  ;;  %v49_v42 = vshrl.u32 %v362_v32, %v46_v29  ;;  %v52_v43 = vshrl.u32 %v363_v34, %v46_v29  ;;  %v55_v44 = vshrl.u32 %v364_v36, %v46_v29 }
  0x29   :  { %v58_v45 = vshrl.u32 %v365_v38, %v46_v29  ;;  %v61_v47 = vshrl.u32 %v366_v46, %v46_v29  ;;  %vm66_vm4 = vcmp.lt.s32.totalorder %v44_v23, 4  ;;  %v149_v51 = vsub.s32 32, %v148_v27 }
  0x2a   :  { %v50_v48 = vor.u32 %v49_v42, %v48_v31  ;;  %v53_v49 = vor.u32 %v52_v43, %v51_v33  ;;  %v56_v50 = vor.u32 %v55_v44, %v54_v35  ;;  %vm65_vm5 = vcmp.lt.s32.totalorder %v44_v23, 3 }
  0x2b   :  { %v59_v52 = vor.u32 %v58_v45, %v57_v37  ;;  %v62_v53 = vor.u32 %v61_v47, %v60_v39  ;;  %v151_v54 = vshll.u32 %v361_v30, %v148_v27  ;;  %v154_v62 = vshll.u32 %v362_v32, %v148_v27 }
  0x2c   :  { %v67_v55 = vsel %vm63_vm2, %v47_v41, %v50_v48  ;;  %v68_v56 = vsel %vm66_vm4, %v56_v50, 2102212464  ;;  %v71_v57 = vsel %vm63_vm2, %v50_v48, %v53_v49  ;;  %v75_v58 = vsel %vm63_vm2, %v53_v49, %v56_v50 }
  0x2d   :  { %v69_v59 = vsel %vm65_vm5, %v53_v49, %v68_v56  ;;  %v72_v60 = vsel %vm66_vm4, %v59_v52, 920167782  ;;  %v76_v61 = vsel %vm66_vm4, %v62_v53, 1326507024  ;;  %v150_v1 = vshrl.u32 %v361_v30, %v149_v51 }
  0x2e   :  { %v73_v63 = vsel %vm65_vm5, %v56_v50, %v72_v60  ;;  %v77_v0 = vsel %vm65_vm5, %v59_v52, %v76_v61  ;;  %v152_v2 = vshrl.u32 %v362_v32, %v149_v51  ;;  %v70_v3 = vsel %vm64_vm3, %v67_v55, %v69_v59 }
  0x2f   :  { %v74_v4 = vsel %vm64_vm3, %v71_v57, %v73_v63  ;;  %v78_v5 = vsel %vm64_vm3, %v75_v58, %v77_v0  ;;  %v155_v9 = vshrl.u32 %v363_v34, %v149_v51  ;;  %v157_v17 = vshll.u32 %v363_v34, %v148_v27 }
  0x30   :  { %v418_v11 = vmul.u32.u64.low %v405_v26, %v78_v5  ;;  %v419_v12 = vmul.u32.u64.high %v405_v26, %v78_v5, %v418_v11  ;;  %v422_v13 = vmul.u32.u64.low %v405_v26, %v74_v4  ;;  %v423_v14 = vmul.u32.u64.high %v405_v26, %v74_v4, %v422_v13 }
  0x31   :  { %v153_v15 = vor.u32 %v152_v2, %v151_v54  ;;  %v156_v16 = vor.u32 %v155_v9, %v154_v62  ;;  %v158_v18 = vshrl.u32 %v364_v36, %v149_v51  ;;  %v160_v19 = vshll.u32 %v364_v36, %v148_v27 }
  0x32   :  { %v161_v20 = vshrl.u32 %v365_v38, %v149_v51  ;;  %v163_v21 = vshll.u32 %v365_v38, %v148_v27  ;;  %v164_v22 = vshrl.u32 %v366_v46, %v149_v51  ;;  %v86_v23 = vmul.u32 %v405_v26, %v70_v3 }
  0x33   :  { %v159_v24 = vor.u32 %v158_v18, %v157_v17  ;;  %vm166_vm6 = vcmp.lt.s32.totalorder %v409_v40, 1  ;;  %vm167_vm7 = vcmp.lt.s32.totalorder %v409_v40, 2  ;;  %vm88_vm8 = vc.u32 %v419_v12, %v422_v13 }
  0x34   :  { %v89_v25 = vadd.s32 1, %v423_v14  ;;  %v162_v29 = vor.u32 %v161_v20, %v160_v19  ;;  %vm168_vm9 = vcmp.lt.s32.totalorder %v409_v40, 3  ;;  %v165_v30 = vor.u32 %v164_v22, %v163_v21 }
  0x35   :  { %vm169_vm10 = vcmp.lt.s32.totalorder %v409_v40, 4  ;;  %v170_v31 = vsel %vm166_vm6, %v150_v1, %v153_v15  ;;  %v174_v27 = vsel %vm166_vm6, %v153_v15, %v156_v16  ;;  %v178_v34 = vsel %vm166_vm6, %v156_v16, %v159_v24 }
  0x36   :  { %v90_v32 = vsel %vm88_vm8, %v89_v25, %v423_v14  ;;  %v171_v26 = vsel %vm169_vm10, %v159_v24, 2102212464  ;;  %v175_v33 = vsel %vm169_vm10, %v162_v29, 920167782  ;;  %v179_v38 = vsel %vm169_vm10, %v165_v30, 1326507024 }
  0x37   :  { %v91_v35 = vadd.s32 %v90_v32, %v86_v23  ;;  %v172_v36 = vsel %vm168_vm9, %v156_v16, %v171_v26  ;;  %v176_v37 = vsel %vm168_vm9, %v159_v24, %v175_v33  ;;  %v180_v42 = vsel %vm168_vm9, %v162_v29, %v179_v38 }
  0x38   :  { %v173_v39 = vsel %vm167_vm7, %v170_v31, %v172_v36  ;;  %v177_v41 = vsel %vm167_vm7, %v174_v27, %v176_v37  ;;  %v181_v44 = vsel %vm167_vm7, %v178_v34, %v180_v42  ;;  %v87_v63 = vadd.s32 %v422_v13, %v419_v12 }
  0x39   :  { %v92_v43 = vadd.s32 536870912, %v91_v35  ;;  %v440_v45 = vmul.u32.u64.low %v407_v28, %v177_v41  ;;  %v441_v46 = vmul.u32.u64.high %v407_v28, %v177_v41, %v440_v45  ;;  %v189_v50 = vmul.u32 %v407_v28, %v173_v39 }
  0x3a   :  { %v444_v47 = vmul.u32.u64.low %v407_v28, %v181_v44  ;;  %v445_v48 = vmul.u32.u64.high %v407_v28, %v181_v44, %v444_v47  ;;  %vm123_vm5 = vweird.f32 %v393_v6  ;;  %vm226_vm9 = vweird.f32 %v395_v7 }
  0x3b   :  { %v93_v49 = vshrl.u32 %v92_v43, 30  ;;  %v192_v52 = vadd.s32 1, %v441_v46 }
  0x3c   :  { %vm191_vm11 = vc.u32 %v445_v48, %v440_v45  ;;  %v190_v19 = vadd.s32 %v440_v45, %v445_v48 }
  0x3d   :  { %v94_v51 = vshll.u32 %v93_v49, 30  ;;  %v193_v40 = vsel %vm191_vm11, %v192_v52, %v441_v46  ;;  %v117_v31 = vsub.s32 4, %v93_v49 }
  0x3e   :  { %v194_v54 = vadd.s32 %v193_v40, %v189_v50 }
  0x3f   :  { %v95_v53 = vsub.s32 %v91_v35, %v94_v51  ;;  %v118_v36 = vsel %vm33_vm14, %v117_v31, %v93_v49 }
  0x40   :  { %v195_v56 = vadd.s32 536870912, %v194_v54  ;;  %v120_v8 = vsel %vm456_vm15, 0, %v118_v36 }
  0x41   :  { %v97_v55 = vsub.s32 0, %v95_v53  ;;  %v124_v43 = vand.u32 3, %v120_v8 }
  0x42   :  { %v196_v58 = vshrl.u32 %v195_v56, 30 }
  0x43   :  { %v269_v57 = vmin.u32 %v97_v55, %v95_v53  ;;  %vm129_vm2 = vcmp.eq.s32.totalorder %v124_v43, 2  ;;  %vm126_vm3 = vcmp.eq.s32.totalorder %v124_v43, 0  ;;  %vm125_vm4 = vcmp.lt.s32.totalorder %v124_v43, 2 }
  0x44   :  { %v197_v60 = vshll.u32 %v196_v58, 30  ;;  %v220_v42 = vsub.s32 4, %v196_v58 }
  0x45   :  { %v99_v59 = vclz %v269_v57 }
  0x46   :  { %v198_v62 = vsub.s32 %v194_v54, %v197_v60  ;;  %v221_v46 = vsel %vm136_vm0, %v220_v42, %v196_v58 }
  0x47   :  { %v270_v61 = vadd.s32 4294967294, %v99_v59  ;;  %v223_v50 = vsel %vm468_vm1, 0, %v221_v46 }
  0x48   :  { %v200_v0 = vsub.s32 0, %v198_v62  ;;  %v227_v40 = vand.u32 3, %v223_v50 }
  0x49   :  { %vm271_vm12 = vcmp.lt.s32.totalorder %v270_v61, 0 }
  0x4a   :  { %v102_v28 = vsel %vm271_vm12, 0, %v270_v61  ;;  %v273_v4 = vmin.u32 %v200_v0, %v198_v62  ;;  %vm232_vm6 = vcmp.eq.s32.totalorder %v227_v40, 2  ;;  %vm229_vm7 = vcmp.eq.s32.totalorder %v227_v40, 0 }
  0x4b   :  { %v103_v1 = vsub.s32 32, %v102_v28  ;;  %v104_v2 = vshll.u32 %v95_v53, %v102_v28  ;;  %v107_v3 = vsub.s32 4294967266, %v102_v28  ;;  %vm228_vm8 = vcmp.lt.s32.totalorder %v227_v40, 2 }
  0x4c   :  { %v202_v11 = vclz %v273_v4 }
  0x4d   :  { %v105_v5 = vshrl.u32 %v87_v63, %v103_v1  ;;  %v108_v9 = vadd.s32 127, %v107_v3 }
  0x4e   :  { %v274_v16 = vadd.s32 4294967294, %v202_v11 }
  0x4f   :  { %v106_v14 = vor.u32 %v105_v5, %v104_v2  ;;  %v109_v15 = vshll.u32 %v108_v9, 23 }
  0x50   :  { %vm275_vm13 = vcmp.lt.s32.totalorder %v274_v16, 0 }
  0x51   :  { %v110_v17 = vor.u32 4788187, %v109_v15  ;;  %v113_v18 = vcvt.s32.f32 %v106_v14  ;;  %v205_v12 = vsel %vm275_vm13, 0, %v274_v16 }
  0x52   :  { %v206_v13 = vsub.s32 32, %v205_v12  ;;  %v207_v21 = vshll.u32 %v198_v62, %v205_v12  ;;  %v210_v22 = vsub.s32 4294967266, %v205_v12 }
  0x53   :  { %v111_v20 = vand.u32 2147483647, %v110_v17 }
  0x54   :  { %v208_v24 = vshrl.u32 %v190_v19, %v206_v13  ;;  %v211_v25 = vadd.s32 127, %v210_v22 }
  0x55   :  { %v114_v23 = vmul.f32 %v113_v18, %v111_v20 }
  0x56   :  { %v209_v27 = vor.u32 %v208_v24, %v207_v21  ;;  %v212_v32 = vshll.u32 %v211_v25, 23 }
  0x57   :  { %v115_v30 = vxor.u32 2147483648, %v114_v23 }
  0x58   :  { %v213_v34 = vor.u32 4788187, %v212_v32  ;;  %v216_v35 = vcvt.s32.f32 %v209_v27 }
  0x59   :  { %v116_v26 = vsel %vm33_vm14, %v115_v30, %v114_v23 }
  0x5a   :  { %v119_v33 = vsel %vm456_vm15, %v393_v6, %v116_v26  ;;  %v214_v37 = vand.u32 2147483647, %v213_v34 }
  0x5b   :  { %294 = vcosq.f32 %v119_v33 }
  0x5c   :  { %296 = vsinq.f32 %v119_v33  ;;  %v217_v38 = vmul.f32 %v216_v35, %v214_v37 }
  0x5e   :  { %v218_v41 = vxor.u32 2147483648, %v217_v38 }
  0x60   :  { %v219_v44 = vsel %vm136_vm0, %v218_v41, %v217_v38 }
  0x61   :  { %v222_v45 = vsel %vm468_vm1, %v395_v7, %v219_v44 }
  0x62   :  { %298 = vcosq.f32 %v222_v45 }
  0x63   :  { %300 = vsinq.f32 %v222_v45 }
  0x65   :  { %v295_v47 = vpop.eup %294 }
  0x66   :  { %v297_v48 = vpop.eup %296  ;;  %v130_v49 = vxor.u32 2147483648, %v295_v47 }
  0x67   :  { %v127_v10 = vxor.u32 2147483648, %v297_v48 }
  0x68   :  { %v131_v51 = vsel %vm129_vm2, %v130_v49, %v297_v48 }
  0x69   :  { %v128_v52 = vsel %vm126_vm3, %v295_v47, %v127_v10 }
  0x6a   :  { %v132_v53 = vsel %vm125_vm4, %v128_v52, %v131_v51 }
  0x6b   :  { %v133_v54 = vsel %vm123_vm5, nan, %v132_v53 }
  0x6c   :  { %v239_v55 = vadd.f32 1.0, %v133_v54  ;;  %v299_v56 = vpop.eup %298  ;;  %v237_v63 = vsub.f32 1.0, %v133_v54 }
  0x6d   :  { %v301_v57 = vpop.eup %300  ;;  %v233_v58 = vxor.u32 2147483648, %v299_v56 }
  0x6e   :  { %302 = vrcp.f32 %v239_v55  ;;  %v230_v59 = vxor.u32 2147483648, %v301_v57 }
  0x6f   :  { %v234_v60 = vsel %vm232_vm6, %v233_v58, %v301_v57 }
  0x70   :  { %v231_v61 = vsel %vm229_vm7, %v299_v56, %v230_v59 }
  0x71   :  { %v235_v62 = vsel %vm228_vm8, %v231_v61, %v234_v60 }
  0x72   :  { %v236_v6 = vsel %vm226_vm9, nan, %v235_v62 }
  0x73   :  { %v240_v28 = vadd.f32 1.0, %v236_v6  ;;  %v238_v2 = vsub.f32 1.0, %v236_v6 }
  0x75   :  { %304 = vrcp.f32 %v240_v28 }
  0x78   :  { %v303_v0 = vpop.eup %302 }
  0x79   :  { %v243_v1 = vmul.f32 %v303_v0, %v237_v63 }
  0x7b   :  { %306 = vlog2.f32 %v243_v1 }
  0x7f   :  { %v305_v3 = vpop.eup %304 }
  0x80   :  { %v244_v4 = vmul.f32 %v305_v3, %v238_v2 }
  0x82   :  { %308 = vlog2.f32 %v244_v4 }
  0x85   :  { %v307_v5 = vpop.eup %306 }
  0x86   :  { %v246_v9 = vmul.f32 0.6931472, %v307_v5 }
  0x88   :  { %249 = vst [vmem:[#allocation5] sm:$0xff] %v246_v9 }
  0x8c   :  { %v309_v7 = vpop.eup %308 }
  0x8d   :  { %v248_v11 = vmul.f32 0.6931472, %v309_v7 }
  0x8f   :  { %250 = vst [vmem:[#allocation5 + $0x8] sm:$0xff] %v248_v11 }
  0x90   :  { %343 = shalt.err (!%p340_p12)
}
  0x91   :  { %s344_s24 = scalar_lea.hbm %s495_s1, 256 }
  0x92   :  { %p345_p13 = scmp.ne.s32.totalorder %s495_s1, %s344_s24  ;;  %p348_p0 = scmp.lt.u32.totalorder %s344_s24, %s495_s1 }
  0x94   :  { %p350_p1 = pnand %p348_p0, %p345_p13 }
  0x96   :  { %353 = shalt.err (!%p350_p1)
}
  0x97   :  { %262 = dma.vmem_to_hbm [thread:$0]  %s257_s20, 256, %s495_s1, [#allocation4], %s359_s16, %s359_s16, %s360_s17  }
  0x98   :  { %356 = dma.done.wait [#allocation4], 256  }
  0x99   :  { %357 = vsyncadd [#allocation4], 4294967040 }
  0x9a   :  { %266 = vsyncpa [#allocation3], 1 }
  0x9b   :  { %267 = vsyncpa [#allocation4], 1 }

</bundles_post_ra>
